<compile_context>
chip_gen: v5e
topology: v5e:2x2
jax: 0.10.0
libtpu: 0.0.40
codegen_flags: <defaults>
</compile_context>

<pallas_src>
import functools
import math

import jax
import jax.numpy as jnp
from jax.experimental import pallas as pl
from jax.experimental.pallas import tpu as pltpu


# ----------------------------- config ---------------------------------------
CFG = dict(
    conv_dim=16,
    conv_kernels=(10, 3),
    conv_strides=(5, 2),
    hidden_size=32,
    num_heads=4,
    intermediate_size=64,
    num_layers=2,
    num_buckets=16,
    max_distance=32,
    lora_rank=4,
    pos_conv_kernel=8,
    pos_conv_groups=4,
    layer_norm_eps=1e-5,
)


def _gelu(x):
    # TODO(synk): tanh-approx GELU; PyTorch nn.GELU default is exact erf GELU.
    return 0.5 * x * (1.0 + jnp.tanh(0.7978845608028654 * (x + 0.044715 * x * x * x)))


def _ln(x, g, b, eps):
    mean = jnp.mean(x, axis=-1, keepdims=True)
    var = jnp.mean((x - mean) ** 2, axis=-1, keepdims=True)
    return (x - mean) * jax.lax.rsqrt(var + eps) * g + b


def _sigmoid(x):
    return 1.0 / (1.0 + jnp.exp(-x))


# --------------------------- Pallas kernels ---------------------------------
def _conv0_gn_gelu_kernel(p_ref, w_ref, g_ref, b_ref, o_ref, *, eps):
    """conv0 (im2col matmul) + GroupNorm(num_groups=C) + affine + GELU."""
    y = jnp.dot(p_ref[0], w_ref[...], preferred_element_type=jnp.float32)  # (L0, C)
    # GroupNorm with one channel per group: stats over length, per channel.
    mean = jnp.mean(y, axis=0, keepdims=True)
    var = jnp.mean((y - mean) ** 2, axis=0, keepdims=True)
    y = (y - mean) * jax.lax.rsqrt(var + eps) * g_ref[...] + b_ref[...]
    o_ref[0] = _gelu(y)


def _conv1_fproj_kernel(p_ref, w_ref, lng_ref, lnb_ref, fpw_ref, fpb_ref, o_ref, *, eps):
    """conv1 (im2col matmul) + GELU + feature-projection LayerNorm + Linear."""
    y = _gelu(jnp.dot(p_ref[0], w_ref[...], preferred_element_type=jnp.float32))  # (T, C)
    y = _ln(y, lng_ref[...], lnb_ref[...], eps)
    o_ref[0] = jnp.dot(y, fpw_ref[...], preferred_element_type=jnp.float32) + fpb_ref[...]


def _posconv_encln_kernel(p_ref, w_ref, b_ref, h_ref, g_ref, bt_ref, o_ref, *, eps):
    """grouped pos-conv (block-diagonal matmul) + GELU + residual + encoder LN."""
    pos = _gelu(jnp.dot(p_ref[0], w_ref[...], preferred_element_type=jnp.float32) + b_ref[...])
    o_ref[0] = _ln(h_ref[0] + pos, g_ref[...], bt_ref[...], eps)


def _encoder_layer_kernel(h_ref, pb_ref, wqkvg_ref, bqkvg_ref, gruc_ref,
                          ow_ref, ob_ref, ln1g_ref, ln1b_ref,
                          wi_ref, bi_ref, wo_ref, bo_ref, ln2g_ref, ln2b_ref,
                          o_ref, *, num_heads, head_dim, eps):
    """Fully fused WavLM encoder layer (one batch element per grid step)."""
    h = h_ref[0]                                              # (T, H)
    H = num_heads * head_dim
    scale = 1.0 / math.sqrt(head_dim)

    # Fused Q | K | V | gru_rel_pos projection (single MXU matmul).
    proj = jnp.dot(h, wqkvg_ref[...], preferred_element_type=jnp.float32) + bqkvg_ref[...]
    q = proj[:, 0:H] * scale
    k = proj[:, H:2 * H]
    v = proj[:, 2 * H:3 * H]
    gates = _sigmoid(proj[:, 3 * H:3 * H + 2 * num_heads])    # (T, 2*nH)
    gate_a = gates[:, :num_heads]
    gate_b = gates[:, num_heads:]
    gate_out = gate_a * (gate_b * gruc_ref[...] - 1.0) + 2.0  # (T, nH)

    ow = ow_ref[...]                                          # (H, H)
    attn_out = None
    for hh in range(num_heads):                               # static unroll (nH small)
        sl = slice(hh * head_dim, (hh + 1) * head_dim)
        s = jax.lax.dot_general(q[:, sl], k[:, sl], (((1,), (1,)), ((), ())),
                                preferred_element_type=jnp.float32)     # (T, T)
        s = s + gate_out[:, hh:hh + 1] * pb_ref[hh]
        m = jnp.max(s, axis=-1, keepdims=True)
        e = jnp.exp(s - m)
        a = e * pl.reciprocal(jnp.sum(e, axis=-1, keepdims=True), approx=True)
        ctx = jnp.dot(a, v[:, sl], preferred_element_type=jnp.float32)  # (T, Dh)
        # Fold this head's context straight into the output projection.
        term = jnp.dot(ctx, ow[sl, :], preferred_element_type=jnp.float32)
        attn_out = term if attn_out is None else attn_out + term
    attn_out = attn_out + ob_ref[...]

    h1 = _ln(h + attn_out, ln1g_ref[...], ln1b_ref[...], eps)            # LN after residual
    # FFN with LoRA already merged into wi/wo.
    y = _gelu(jnp.dot(h1, wi_ref[...], preferred_element_type=jnp.float32) + bi_ref[...])
    z = jnp.dot(y, wo_ref[...], preferred_element_type=jnp.float32) + bo_ref[...]
    o_ref[0] = _ln(h1 + z, ln2g_ref[...], ln2b_ref[...], eps)


# ------------------------- generic per-batch launcher -------------------------
def _per_batch_call(kernel, out_shape, batched_flags, args):
    """Grid over the leading batch dim.  Args flagged True are blocked
    per-batch as (1, *trailing); the rest (weights / biases / shared bias
    tensors) are passed as whole VMEM-resident blocks (same block index every
    step, so Pallas does not re-DMA them)."""
    B = out_shape[0]
    in_specs = []
    for a, batched in zip(args, batched_flags):
        if batched:
            in_specs.append(pl.BlockSpec(
                (1,) + a.shape[1:],
                lambda i, _nd=a.ndim: (i,) + (0,) * (_nd - 1)))
        else:
            in_specs.append(pl.BlockSpec(
                a.shape, lambda i, _nd=a.ndim: (0,) * _nd))
    return pl.pallas_call(
        kernel,
        out_shape=jax.ShapeDtypeStruct(out_shape, jnp.float32),
        grid=(B,),
        in_specs=in_specs,
        out_specs=pl.BlockSpec(
            (1,) + out_shape[1:],
            lambda i, _nd=len(out_shape): (i,) + (0,) * (_nd - 1)),
        compiler_params=pltpu.CompilerParams(dimension_semantics=("parallel",)),
    )(*[a.astype(jnp.float32) for a in args])


# ------------------------- WavLM pieces (prep + kernels) ---------------------
def compute_position_bias(T, num_buckets, max_distance, rel_embed):
    """Relative-position bucket gather (one-time JAX prep) -> (nH, T, T)."""
    ctx = jnp.arange(T)[:, None]
    mem = jnp.arange(T)[None, :]
    rel = mem - ctx
    nb = num_buckets // 2
    buckets = (rel > 0).astype(jnp.int32) * nb
    rel_abs = jnp.abs(rel)
    max_exact = nb // 2
    is_small = rel_abs < max_exact
    rel_f = jnp.maximum(rel_abs, 1).astype(jnp.float32)
    large = jnp.log(rel_f / max_exact) / math.log(max_distance / max_exact) * (nb - max_exact)
    large = (max_exact + large).astype(jnp.int32)
    large = jnp.minimum(large, nb - 1)
    buckets = buckets + jnp.where(is_small, rel_abs, large)
    values = jnp.take(rel_embed, buckets, axis=0)   # (T, T, nH)
    return values.transpose(2, 0, 1)                # (nH, T, T)


def wavlm_forward(x, p, cfg):
    B, L = x.shape
    eps = cfg["layer_norm_eps"]
    C = cfg["conv_dim"]
    H = cfg["hidden_size"]
    nH = cfg["num_heads"]
    Dh = H // nH
    K0, K1 = cfg["conv_kernels"]
    s0, s1 = cfg["conv_strides"]

    # -------- feature extractor: conv0 + GroupNorm + GELU (fused) ----------
    L0 = (L - K0) // s0 + 1
    idx0 = jnp.arange(L0)[:, None] * s0 + jnp.arange(K0)[None, :]
    patches0 = x[:, idx0]                                    # (B, L0, K0); Cin = 1
    w0 = p["conv0_w"].reshape(C, K0).T                       # (K0, C); conv has no bias
    h = _per_batch_call(
        functools.partial(_conv0_gn_gelu_kernel, eps=1e-5),  # torch GroupNorm default eps
        (B, L0, C), (True, False, False, False),
        (patches0, w0, p["gn_g"].reshape(1, C), p["gn_b"].reshape(1, C)))

    # -------- conv1 + GELU + feature-projection LN + Linear (fused) --------
    T = (L0 - K1) // s1 + 1
    idx1 = jnp.arange(T)[:, None] * s1 + jnp.arange(K1)[None, :]
    patches1 = h[:, idx1, :].reshape(B, T, K1 * C)           # (k, c) flatten order
    w1 = p["conv1_w"].transpose(2, 1, 0).reshape(K1 * C, C)  # matches (k, c) order
    h = _per_batch_call(
        functools.partial(_conv1_fproj_kernel, eps=eps),
        (B, T, H), (True,) + (False,) * 5,
        (patches1, w1, p["fp_ln_g"].reshape(1, C), p["fp_ln_b"].reshape(1, C),
         p["fp_w"], p["fp_b"].reshape(1, H)))

    # -------- positional conv (grouped -> block-diag matmul) + residual + LN
    Kp = cfg["pos_conv_kernel"]
    G = cfg["pos_conv_groups"]
    pad = Kp // 2
    Cg = H // G
    hp = jnp.pad(h, ((0, 0), (pad, pad), (0, 0)))
    # WavLMSamePadLayer drops the last output step for an even kernel, so we
    # only build the first T windows.
    idxp = jnp.arange(T)[:, None] + jnp.arange(Kp)[None, :]
    patches_p = hp[:, idxp, :].reshape(B, T, Kp * H)
    wp = jnp.zeros((Kp, H, H), jnp.float32)
    for g in range(G):                                       # block-diagonal grouped weight
        wg = p["pos_conv_w"][g * Cg:(g + 1) * Cg]            # (Cout_g, Cin_g, Kp)
        wp = wp.at[:, g * Cg:(g + 1) * Cg, g * Cg:(g + 1) * Cg].set(wg.transpose(2, 1, 0))
    wp = wp.reshape(Kp * H, H)
    # TODO(synk): weight-norm on pos_conv treated as identity (g*v/||v|| == v at init).
    h = _per_batch_call(
        functools.partial(_posconv_encln_kernel, eps=eps),
        (B, T, H), (True, False, False, True, False, False),
        (patches_p, wp, p["pos_conv_b"].reshape(1, H), h,
         p["enc_ln_g"].reshape(1, H), p["enc_ln_b"].reshape(1, H)))

    # -------- relative position bias: (nH, T, T), shared across the batch ---
    pb = compute_position_bias(T, cfg["num_buckets"], cfg["max_distance"], p["rel_embed"])

    # -------- encoder layers: one fused pallas_call per layer ---------------
    scaling = 1.0 / cfg["lora_rank"]
    for lp in p["layers"]:
        # One-time weight prep (outside the kernel):
        #   * gru_rel_pos: pre-sum the (2,4)->2 reduce into the weight, lay it
        #     out block-diagonally per head, append to the QKV projection.
        gru_sw = lp["gru_w"].reshape(Dh, 2, 4).sum(-1)        # (Dh, 2)
        gru_sb = lp["gru_b"].reshape(2, 4).sum(-1)            # (2,)
        gru_bd = jnp.zeros((H, 2 * nH), jnp.float32)
        for hh in range(nH):
            gru_bd = gru_bd.at[hh * Dh:(hh + 1) * Dh, hh].set(gru_sw[:, 0])
            gru_bd = gru_bd.at[hh * Dh:(hh + 1) * Dh, nH + hh].set(gru_sw[:, 1])
        wqkvg = jnp.concatenate([lp["q_w"], lp["k_w"], lp["v_w"], gru_bd], axis=1)
        bqkvg = jnp.concatenate([lp["q_b"], lp["k_b"], lp["v_b"],
                                 jnp.full((nH,), gru_sb[0]),
                                 jnp.full((nH,), gru_sb[1])]).reshape(1, -1)
        #   * LoRA merged into the FFN dense weights.
        wi_eff = lp["ffn_wi"] + scaling * (lp["lora_ai"] @ lp["lora_bi"])
        wo_eff = lp["ffn_wo"] + scaling * (lp["lora_ao"] @ lp["lora_bo"])
        h = _per_batch_call(
            functools.partial(_encoder_layer_kernel,
                              num_heads=nH, head_dim=Dh, eps=eps),
            (B, T, H), (True,) + (False,) * 14,
            (h, pb, wqkvg, bqkvg, lp["gru_const"].reshape(1, nH),
             lp["out_w"], lp["out_b"].reshape(1, H),
             lp["ln1_g"].reshape(1, H), lp["ln1_b"].reshape(1, H),
             wi_eff, lp["ffn_bi"].reshape(1, -1),
             wo_eff, lp["ffn_bo"].reshape(1, H),
             lp["ln2_g"].reshape(1, H), lp["ln2_b"].reshape(1, H)))
    return h                     # == encoder(...).hidden_states[-1]


# ------------------------------ params ---------------------------------------
def init_params(key, cfg):
    def nrm(k, shape, scale=0.02):
        return scale * jax.random.normal(k, shape, dtype=jnp.float32)

    keys = iter(jax.random.split(key, 128))
    C = cfg["conv_dim"]
    H = cfg["hidden_size"]
    nH = cfg["num_heads"]
    Dh = H // nH
    I = cfg["intermediate_size"]
    r = cfg["lora_rank"]
    p = {}
    p["conv0_w"] = nrm(next(keys), (C, 1, cfg["conv_kernels"][0]))
    p["gn_g"] = jnp.ones((C,), jnp.float32)
    p["gn_b"] = jnp.zeros((C,), jnp.float32)
    p["conv1_w"] = nrm(next(keys), (C, C, cfg["conv_kernels"][1]))
    p["fp_ln_g"] = jnp.ones((C,), jnp.float32)
    p["fp_ln_b"] = jnp.zeros((C,), jnp.float32)
    p["fp_w"] = nrm(next(keys), (C, H))
    p["fp_b"] = nrm(next(keys), (H,))
    p["pos_conv_w"] = nrm(next(keys), (H, H // cfg["pos_conv_groups"], cfg["pos_conv_kernel"]))
    p["pos_conv_b"] = nrm(next(keys), (H,))
    p["enc_ln_g"] = jnp.ones((H,), jnp.float32)
    p["enc_ln_b"] = jnp.zeros((H,), jnp.float32)
    p["rel_embed"] = nrm(next(keys), (cfg["num_buckets"], nH))
    layers = []
    for _ in range(cfg["num_layers"]):
        lp = {}
        for nm in ("q", "k", "v", "out"):
            lp[nm + "_w"] = nrm(next(keys), (H, H))
            lp[nm + "_b"] = nrm(next(keys), (H,))
        lp["gru_w"] = nrm(next(keys), (Dh, 8))
        lp["gru_b"] = nrm(next(keys), (8,))
        lp["gru_const"] = jnp.ones((nH,), jnp.float32)
        lp["ln1_g"] = jnp.ones((H,), jnp.float32)
        lp["ln1_b"] = jnp.zeros((H,), jnp.float32)
        lp["ln2_g"] = jnp.ones((H,), jnp.float32)
        lp["ln2_b"] = jnp.zeros((H,), jnp.float32)
        lp["ffn_wi"] = nrm(next(keys), (H, I))
        lp["ffn_bi"] = nrm(next(keys), (I,))
        lp["lora_ai"] = nrm(next(keys), (H, r))
        lp["lora_bi"] = nrm(next(keys), (r, I))
        lp["ffn_wo"] = nrm(next(keys), (I, H))
        lp["ffn_bo"] = nrm(next(keys), (H,))
        lp["lora_ao"] = nrm(next(keys), (I, r))
        lp["lora_bo"] = nrm(next(keys), (r, H))
        layers.append(lp)
    p["layers"] = layers
    return p


# -------------------------------- main ---------------------------------------
if __name__ == "__main__":
    cfg = CFG
    key = jax.random.PRNGKey(0)
    k_x, k_p = jax.random.split(key)
    # raw waveform: 170 samples -> conv stack -> T = 16 frames
    x = jax.random.normal(k_x, (2, 170), dtype=jnp.float32)
    params = init_params(k_p, cfg)
    out = wavlm_forward(x, params, cfg)
    out = jax.block_until_ready(out)
    assert out.shape == (2, 16, cfg["hidden_size"]), out.shape
    assert bool(jnp.isfinite(out).all())
    print("KERNEL_OK")
</pallas_src>

<mosaic_0001>
module attributes {stable_mosaic.version = 11 : i64} {
  func.func @_conv0_gn_gelu_kernel(%arg0: i32, %arg1: memref<1x33x10xf32, #tpu.memory_space<vmem>>, %arg2: memref<10x16xf32, #tpu.memory_space<vmem>>, %arg3: memref<1x16xf32, #tpu.memory_space<vmem>>, %arg4: memref<1x16xf32, #tpu.memory_space<vmem>>, %arg5: memref<1x33x16xf32, #tpu.memory_space<vmem>>) attributes {dimension_semantics = [#tpu.dimension_semantics<parallel>], iteration_bounds = array<i64: 2>, scalar_prefetch = 0 : i64, scratch_operands = 0 : i64, tpu.core_type = #tpu.core_type<tc>, window_params = [{transform_indices = @transform_0, window_bounds = array<i64: 1, 33, 10>}, {pipeline_mode = #tpu.pipeline_mode<synchronous>, transform_indices = @transform_1, window_bounds = array<i64: 10, 16>}, {pipeline_mode = #tpu.pipeline_mode<synchronous>, transform_indices = @transform_2, window_bounds = array<i64: 1, 16>}, {pipeline_mode = #tpu.pipeline_mode<synchronous>, transform_indices = @transform_3, window_bounds = array<i64: 1, 16>}, {transform_indices = @transform_4, window_bounds = array<i64: 1, 33, 16>}]} {
    %c0 = arith.constant 0 : index
    %c0_0 = arith.constant 0 : index
    %c0_1 = arith.constant 0 : index
    %0 = vector.load %arg1[%c0, %c0_0, %c0_1] : memref<1x33x10xf32, #tpu.memory_space<vmem>>, vector<1x33x10xf32>
    %1 = vector.shape_cast %0 : vector<1x33x10xf32> to vector<33x10xf32>
    %c0_2 = arith.constant 0 : index
    %c0_3 = arith.constant 0 : index
    %2 = vector.load %arg2[%c0_2, %c0_3] : memref<10x16xf32, #tpu.memory_space<vmem>>, vector<10x16xf32>
    %cst = arith.constant dense<0.000000e+00> : vector<33x16xf32>
    %3 = tpu.matmul %1, %2, %cst {dimension_numbers = #tpu.dot_dimension_numbers<[1], [0], [0], [1], [0, 0, 1, 1], [], []>} : vector<33x10xf32>, vector<10x16xf32>, vector<33x16xf32> -> vector<33x16xf32>
    %cst_4 = arith.constant dense<0.000000e+00> : vector<16xf32>
    %4 = vector.multi_reduction <add>, %3, %cst_4 [0] : vector<33x16xf32> to vector<16xf32>
    %5 = vector.shape_cast %4 : vector<16xf32> to vector<1x16xf32>
    %cst_5 = arith.constant 3.300000e+01 : f32
    %6 = vector.broadcast %cst_5 : f32 to vector<1x16xf32>
    %7 = arith.divf %5, %6 : vector<1x16xf32>
    %8 = vector.broadcast %7 : vector<1x16xf32> to vector<33x16xf32>
    %9 = arith.subf %3, %8 : vector<33x16xf32>
    %10 = arith.mulf %9, %9 : vector<33x16xf32>
    %cst_6 = arith.constant dense<0.000000e+00> : vector<16xf32>
    %11 = vector.multi_reduction <add>, %10, %cst_6 [0] : vector<33x16xf32> to vector<16xf32>
    %12 = vector.shape_cast %11 : vector<16xf32> to vector<1x16xf32>
    %cst_7 = arith.constant 3.300000e+01 : f32
    %13 = vector.broadcast %cst_7 : f32 to vector<1x16xf32>
    %14 = arith.divf %12, %13 : vector<1x16xf32>
    %15 = vector.broadcast %7 : vector<1x16xf32> to vector<33x16xf32>
    %16 = arith.subf %3, %15 : vector<33x16xf32>
    %cst_8 = arith.constant 9.99999974E-6 : f32
    %17 = vector.broadcast %cst_8 : f32 to vector<1x16xf32>
    %18 = arith.addf %14, %17 : vector<1x16xf32>
    %19 = math.rsqrt %18 : vector<1x16xf32>
    %20 = vector.broadcast %19 : vector<1x16xf32> to vector<33x16xf32>
    %21 = arith.mulf %16, %20 : vector<33x16xf32>
    %c0_9 = arith.constant 0 : index
    %c0_10 = arith.constant 0 : index
    %22 = vector.load %arg3[%c0_9, %c0_10] : memref<1x16xf32, #tpu.memory_space<vmem>>, vector<1x16xf32>
    %23 = vector.broadcast %22 : vector<1x16xf32> to vector<33x16xf32>
    %24 = arith.mulf %21, %23 : vector<33x16xf32>
    %c0_11 = arith.constant 0 : index
    %c0_12 = arith.constant 0 : index
    %25 = vector.load %arg4[%c0_11, %c0_12] : memref<1x16xf32, #tpu.memory_space<vmem>>, vector<1x16xf32>
    %26 = vector.broadcast %25 : vector<1x16xf32> to vector<33x16xf32>
    %27 = arith.addf %24, %26 : vector<33x16xf32>
    %cst_13 = arith.constant 5.000000e-01 : f32
    %28 = vector.broadcast %cst_13 : f32 to vector<33x16xf32>
    %29 = arith.mulf %28, %27 : vector<33x16xf32>
    %cst_14 = arith.constant 4.471500e-02 : f32
    %30 = vector.broadcast %cst_14 : f32 to vector<33x16xf32>
    %31 = arith.mulf %30, %27 : vector<33x16xf32>
    %32 = arith.mulf %31, %27 : vector<33x16xf32>
    %33 = arith.mulf %32, %27 : vector<33x16xf32>
    %34 = arith.addf %27, %33 : vector<33x16xf32>
    %cst_15 = arith.constant 0.797884583 : f32
    %35 = vector.broadcast %cst_15 : f32 to vector<33x16xf32>
    %36 = arith.mulf %35, %34 : vector<33x16xf32>
    %37 = math.tanh %36 : vector<33x16xf32>
    %cst_16 = arith.constant 1.000000e+00 : f32
    %38 = vector.broadcast %cst_16 : f32 to vector<33x16xf32>
    %39 = arith.addf %38, %37 : vector<33x16xf32>
    %40 = arith.mulf %29, %39 : vector<33x16xf32>
    %c0_17 = arith.constant 0 : index
    %c0_18 = arith.constant 0 : index
    %c0_19 = arith.constant 0 : index
    %41 = vector.load %arg5[%c0_17, %c0_18, %c0_19] : memref<1x33x16xf32, #tpu.memory_space<vmem>>, vector<1x33x16xf32>
    %42 = vector.shape_cast %41 : vector<1x33x16xf32> to vector<33x16xf32>
    %43 = vector.shape_cast %40 : vector<33x16xf32> to vector<1x33x16xf32>
    tpu.vector_store %arg5[%c0_17, %c0_18, %c0_19], %43 {strides = array<i32>} : memref<1x33x16xf32, #tpu.memory_space<vmem>>, vector<1x33x16xf32>,
    return
  }
  func.func @transform_0(%arg0: i32) -> (i32, i32, i32) {
    %c0_i32 = arith.constant 0 : i32
    %c0_i32_0 = arith.constant 0 : i32
    %c0_i32_1 = arith.constant 0 : i32
    return %arg0, %c0_i32, %c0_i32_0 : i32, i32, i32
  }
  func.func @transform_1(%arg0: i32) -> (i32, i32) {
    %c0_i32 = arith.constant 0 : i32
    %c0_i32_0 = arith.constant 0 : i32
    %c0_i32_1 = arith.constant 0 : i32
    return %c0_i32, %c0_i32_0 : i32, i32
  }
  func.func @transform_2(%arg0: i32) -> (i32, i32) {
    %c0_i32 = arith.constant 0 : i32
    %c0_i32_0 = arith.constant 0 : i32
    %c0_i32_1 = arith.constant 0 : i32
    return %c0_i32, %c0_i32_0 : i32, i32
  }
  func.func @transform_3(%arg0: i32) -> (i32, i32) {
    %c0_i32 = arith.constant 0 : i32
    %c0_i32_0 = arith.constant 0 : i32
    %c0_i32_1 = arith.constant 0 : i32
    return %c0_i32, %c0_i32_0 : i32, i32
  }
  func.func @transform_4(%arg0: i32) -> (i32, i32, i32) {
    %c0_i32 = arith.constant 0 : i32
    %c0_i32_0 = arith.constant 0 : i32
    %c0_i32_1 = arith.constant 0 : i32
    return %arg0, %c0_i32, %c0_i32_0 : i32, i32, i32
  }
}

</mosaic_0001>

<bundles_post_ra>
// kernel: tpu_custom_call.1
= control target key start
LH: loop header
LB: loop body
LE: loop exit
PB: predicated region body
PF: predicated region fallthrough
CT: control target
= control target key end

     0   :  { %s528_s15 = smov 0   ;;  %s579_s0 = inlined_call_operand.vmem [shape: f32[2,33,10], index: 0, kind: input, shape index: {}]   ;;  %s580_s1 = inlined_call_operand.vmem [shape: f32[10,16], index: 1, kind: input, shape index: {}]   ;;  %s581_s2 = inlined_call_operand.vmem [shape: f32[1,16], index: 2, kind: input, shape index: {}]   ;;  %s582_s3 = inlined_call_operand.vmem [shape: f32[1,16], index: 3, kind: input, shape index: {}]   ;;  %s583_s4 = inlined_call_operand.vmem [shape: f32[2,33,16], index: 4, kind: output, shape index: {}]  }
   0x1 LB: > { %s447_s16 = sadd.s32 4294967295, %s500_s15   ;;  %p451_p0 = scmp.ge.s32.totalorder %s500_s15, 1  ;;  %s500_s15 = sphi %s528_s15, %s14_s15  }
   0x2   : > { %p162_p1 = scmp.lt.s32.totalorder %s500_s15, 3 }
   0x4   : > { %p163_p2 = pnand %p451_p0, %p162_p1 }
   0x5   : > { %p188_p3 = scmp.lt.s32.totalorder (!%p163_p2), %s447_s16, 1 }
   0x6   : > { %166 = sbr.rel (%p163_p2) target bundleno = 254 (0xfe), region = 36 }
   0xb   : > { %v204_v0 = vld [vmem:[%s580_s1 + $0x8] sm:$0x3]  ;;  %vm221_vm0 = vcmask 1041408   ;;  %v203_v1 = vld [vmem:[%s580_s1] sm:$0xff]  ;;  %s585_s16 = smov (!%p188_p3, %s447_s16), 1  ;;  %vm205_vm1 = vcmask 80896  }
   0xc   : > { %463 = vmatpush.msk.msra.mxu2 %vm221_vm0, %v204_v0  ;;  %454 = vmatpush.msk.msra.mxu0 %vm221_vm0, %v204_v0  ;;  %s468_s21 = smul.u32 40, %s585_s16  ;;  %vm257_vm2 = vcmask 130048   ;;  %v502_v9 = vmov 33.0   ;;  %vm265_vm3 = vcmask 122880  }
   0xd   : > { %462 = vmatpush.msk.msra.mxu1 %vm221_vm0, %v204_v0  ;;  %464 = vmatpush.msk.msra.mxu3 %vm221_vm0, %v204_v0  ;;  %480 = vrcp.f32 %v502_v9 }
   0xe   : > { %466 = vmatpush.msra.mxu2 %v203_v1  ;;  %240 = vmatpush.msra.mxu0 %v203_v1  ;;  %s192_s24 = scalar_lea.vmem %s579_s0, %s468_s21  ;;  %s197_s5 = scalar_lea.vmem %s583_s4, %s468_s21 }
   0xf   : > { %465 = vmatpush.msra.mxu1 %v203_v1  ;;  %467 = vmatpush.msra.mxu3 %v203_v1  ;;  %v200_v2 = vld [vmem:[%s192_s24 + $0x10] sm:$0xff]  ;;  %v198_v3 = vld [vmem:[%s192_s24] sm:$0xff]  ;;  %v199_v4 = vld [vmem:[%s192_s24 + $0x8] sm:$0xff] }
  0x10   : > { %457 = vmatmul.msk.f32.vlgmr.msra.gmra.mxu2 %vm205_vm1, %v200_v2  ;;  %455 = vmatmul.msk.f32.vlgmr.msra.gmra.mxu0 %vm205_vm1, %v198_v3  ;;  %v202_v5 = vld [vmem:[%s192_s24 + $0x20] sm:$0x1]  ;;  %v201_v6 = vld [vmem:[%s192_s24 + $0x18] sm:$0xff] }
  0x11   : > { %456 = vmatmul.msk.f32.vlgmr.msra.gmra.mxu1 %vm205_vm1, %v199_v4  ;;  %459 = vmatmul.msk.f32.vlgmr.msra.gmra.mxu3 %vm205_vm1, %v202_v5  ;;  %v478_v4 = vld [vmem:[%s581_s2] ss:$0 sm:$0xff] }
  0x13   : > { %v481_v13 = vpop.eup %480 }
  0x14   : > { %v275_v17 = vmul.f32 33.0, %v481_v13  ;;  %vm279_vm4 = vweird.f32 %v481_v13 }
  0x16   : > { %v276_v23 = vsub.f32 1.0, %v275_v17 }
  0x18   : > { %458 = vmatmul.msk.f32.gmra.mxu2 %vm205_vm1, %v201_v6  ;;  %v277_v26 = vmul.f32 %v481_v13, %v276_v23 }
  0x1a   : > { %v278_v29 = vadd.f32 %v481_v13, %v277_v26 }
  0x1c   : > { %v280_v32 = vsel %vm279_vm4, %v481_v13, %v278_v29 }
  0x8d   : > { %v242_v7 = vpop.f32.mrf.mxu0 }
  0x8e   : > { %v245_v8 = vpop.f32.mrf.mxu1  ;;  %v258_v11 = vsel %vm257_vm2, %v242_v7, 0.0 }
  0x8f   : > { %v259_v12 = vsel %vm257_vm2, %v245_v8, 0.0 }
  0x90   : > { %v260_v14 = vadd.f32 %v259_v12, %v258_v11 }
  0x93   : > { %v248_v10 = vpop.f32.mrf.mxu2 }
  0x94   : > { %v261_v15 = vsel %vm257_vm2, %v248_v10, 0.0  ;;  %v254_v16 = vpop.f32.mrf.mxu3 }
  0x95   : > { %v262_v18 = vadd.f32 %v261_v15, %v260_v14  ;;  %v266_v21 = vsel %vm265_vm3, %v254_v16, 0.0 }
  0x9b   : > { %v251_v19 = vpop.f32.mrf.mxu2 }
  0x9c   : > { %v263_v20 = vsel %vm257_vm2, %v251_v19, 0.0 }
  0x9d   : > { %v264_v22 = vadd.f32 %v263_v20, %v262_v18 }
  0x9f   : > { %v267_v24 = vadd.f32 %v266_v21, %v264_v22 }
  0xa1   : > { %v268_v25 = vrot.slane %v267_v24, 4 }
  0xa3   : > { %v269_v27 = vadd.f32 %v268_v25, %v267_v24 }
  0xa5   : > { %v270_v28 = vrot.slane %v269_v27, 2 }
  0xa7   : > { %v271_v30 = vadd.f32 %v270_v28, %v269_v27 }
  0xa9   : > { %v272_v31 = vrot.slane %v271_v30, 1 }
  0xab   : > { %v273_v33 = vadd.f32 %v272_v31, %v271_v30 }
  0xad   : > { %v281_v34 = vmul.f32 %v280_v32, %v273_v33 }
  0xaf   : > { %v282_v35 = vsub.f32 %v242_v7, %v281_v34  ;;  %v283_v36 = vsub.f32 %v245_v8, %v281_v34  ;;  %v284_v37 = vsub.f32 %v248_v10, %v281_v34  ;;  %v285_v38 = vsub.f32 %v251_v19, %v281_v34  ;;  %v479_v10 = vld [vmem:[%s582_s3] ss:$0 sm:$0xff] }
  0xb0   : > { %v286_v39 = vsub.f32 %v254_v16, %v281_v34 }
  0xb1   : > { %v287_v40 = vmul.f32 %v282_v35, %v282_v35  ;;  %v288_v41 = vmul.f32 %v283_v36, %v283_v36  ;;  %v289_v42 = vmul.f32 %v284_v37, %v284_v37  ;;  %v290_v43 = vmul.f32 %v285_v38, %v285_v38 }
  0xb2   : > { %v291_v47 = vmul.f32 %v286_v39, %v286_v39 }
  0xb3   : > { %v292_v44 = vsel %vm257_vm2, %v287_v40, 0.0  ;;  %v293_v45 = vsel %vm257_vm2, %v288_v41, 0.0  ;;  %v295_v48 = vsel %vm257_vm2, %v289_v42, 0.0  ;;  %v297_v50 = vsel %vm257_vm2, %v290_v43, 0.0 }
  0xb4   : > { %v294_v46 = vadd.f32 %v293_v45, %v292_v44  ;;  %v299_v52 = vsel %vm265_vm3, %v291_v47, 0.0 }
  0xb6   : > { %v296_v49 = vadd.f32 %v295_v48, %v294_v46 }
  0xb8   : > { %v298_v51 = vadd.f32 %v297_v50, %v296_v49 }
  0xba   : > { %v300_v53 = vadd.f32 %v299_v52, %v298_v51 }
  0xbc   : > { %v301_v54 = vrot.slane %v300_v53, 4 }
  0xbe   : > { %v302_v55 = vadd.f32 %v301_v54, %v300_v53 }
  0xc0   : > { %v303_v56 = vrot.slane %v302_v55, 2 }
  0xc2   : > { %v304_v57 = vadd.f32 %v303_v56, %v302_v55 }
  0xc4   : > { %v305_v58 = vrot.slane %v304_v57, 1 }
  0xc6   : > { %v306_v59 = vadd.f32 %v305_v58, %v304_v57 }
  0xc8   : > { %v307_v60 = vmul.f32 %v306_v59, %v280_v32 }
  0xca   : > { %v308_v61 = vadd.f32 1e-05, %v307_v60 }
  0xcc   : > { %482 = vrsqrt.f32 %v308_v61  ;;  %vm315_vm6 = vweird.f32 %v308_v61 }
  0xd2   : > { %v483_v62 = vpop.eup %482 }
  0xd3   : > { %v310_v63 = vmul.f32 %v483_v62, %v308_v61  ;;  %vm316_vm5 = vweird.f32 %v483_v62 }
  0xd4   : > { %vm317_vm7 = vmor %vm315_vm6, %vm316_vm5 }
  0xd5   : > { %v311_v0 = vmul.f32 %v483_v62, %v310_v63 }
  0xd7   : > { %v312_v1 = vmul.f32 0.5, %v311_v0 }
  0xd9   : > { %v313_v2 = vsub.f32 1.5, %v312_v1 }
  0xdb   : > { %v314_v3 = vmul.f32 %v483_v62, %v313_v2 }
  0xdd   : > { %v318_v5 = vsel %vm317_vm7, %v483_v62, %v314_v3 }
  0xde   : > { %v319_v6 = vmul.f32 %v318_v5, %v282_v35  ;;  %v320_v7 = vmul.f32 %v318_v5, %v283_v36  ;;  %v321_v8 = vmul.f32 %v318_v5, %v284_v37  ;;  %v322_v9 = vmul.f32 %v318_v5, %v285_v38 }
  0xdf   : > { %v323_v11 = vmul.f32 %v318_v5, %v286_v39 }
  0xe0   : > { %v328_v12 = vmul.f32 %v478_v4, %v319_v6  ;;  %v329_v13 = vmul.f32 %v478_v4, %v320_v7  ;;  %v330_v14 = vmul.f32 %v478_v4, %v321_v8  ;;  %v331_v15 = vmul.f32 %v478_v4, %v322_v9 }
  0xe1   : > { %v332_v16 = vmul.f32 %v478_v4, %v323_v11 }
  0xe2   : > { %v337_v17 = vadd.f32 %v479_v10, %v328_v12  ;;  %v338_v18 = vadd.f32 %v479_v10, %v329_v13  ;;  %v339_v19 = vadd.f32 %v479_v10, %v330_v14  ;;  %v340_v20 = vadd.f32 %v479_v10, %v331_v15 }
  0xe3   : > { %v341_v21 = vadd.f32 %v479_v10, %v332_v16 }
  0xe4   : > { %v347_v22 = vmul.f32 0.044715, %v337_v17  ;;  %v348_v23 = vmul.f32 0.044715, %v338_v18  ;;  %v349_v24 = vmul.f32 0.044715, %v339_v19 }
  0xe5   : > { %v350_v25 = vmul.f32 0.044715, %v340_v20  ;;  %v351_v26 = vmul.f32 0.044715, %v341_v21  ;;  %v342_v49 = vmul.f32 0.5, %v337_v17  ;;  %v343_v52 = vmul.f32 0.5, %v338_v18 }
  0xe6   : > { %v352_v27 = vmul.f32 %v347_v22, %v337_v17  ;;  %v353_v28 = vmul.f32 %v348_v23, %v338_v18  ;;  %v354_v29 = vmul.f32 %v349_v24, %v339_v19  ;;  %v344_v55 = vmul.f32 0.5, %v339_v19 }
  0xe7   : > { %v355_v30 = vmul.f32 %v350_v25, %v340_v20  ;;  %v356_v31 = vmul.f32 %v351_v26, %v341_v21  ;;  %v345_v59 = vmul.f32 0.5, %v340_v20  ;;  %v346_v62 = vmul.f32 0.5, %v341_v21 }
  0xe8   : > { %v357_v32 = vmul.f32 %v352_v27, %v337_v17  ;;  %v358_v33 = vmul.f32 %v353_v28, %v338_v18  ;;  %v359_v34 = vmul.f32 %v354_v29, %v339_v19 }
  0xe9   : > { %v360_v35 = vmul.f32 %v355_v30, %v340_v20  ;;  %v361_v36 = vmul.f32 %v356_v31, %v341_v21 }
  0xea   : > { %v362_v37 = vadd.f32 %v357_v32, %v337_v17  ;;  %v363_v38 = vadd.f32 %v358_v33, %v338_v18  ;;  %v364_v39 = vadd.f32 %v359_v34, %v339_v19 }
  0xeb   : > { %v365_v40 = vadd.f32 %v360_v35, %v340_v20  ;;  %v366_v41 = vadd.f32 %v361_v36, %v341_v21 }
  0xec   : > { %v367_v42 = vmul.f32 0.7978846, %v362_v37  ;;  %v368_v43 = vmul.f32 0.7978846, %v363_v38  ;;  %v369_v44 = vmul.f32 0.7978846, %v364_v39 }
  0xed   : > { %v370_v45 = vmul.f32 0.7978846, %v365_v40  ;;  %v371_v46 = vmul.f32 0.7978846, %v366_v41 }
  0xee   : > { %484 = vtanh.f32 %v367_v42 }
  0xef   : > { %486 = vtanh.f32 %v368_v43 }
  0xf0   : > { %488 = vtanh.f32 %v369_v44 }
  0xf1   : > { %490 = vtanh.f32 %v370_v45 }
  0xf2   : > { %492 = vtanh.f32 %v371_v46 }
  0xf4   : > { %v485_v47 = vpop.eup %484 }
  0xf5   : > { %v487_v48 = vpop.eup %486  ;;  %v377_v50 = vadd.f32 1.0, %v485_v47 }
  0xf6   : > { %v489_v51 = vpop.eup %488  ;;  %v378_v53 = vadd.f32 1.0, %v487_v48 }
  0xf7   : > { %v491_v54 = vpop.eup %490  ;;  %v379_v56 = vadd.f32 1.0, %v489_v51  ;;  %v382_v57 = vmul.f32 %v377_v50, %v342_v49 }
  0xf8   : > { %v493_v58 = vpop.eup %492  ;;  %v380_v60 = vadd.f32 1.0, %v491_v54  ;;  %v383_v61 = vmul.f32 %v378_v53, %v343_v52 }
  0xf9   : > { %v381_v63 = vadd.f32 1.0, %v493_v58  ;;  %v384_v0 = vmul.f32 %v379_v56, %v344_v55  ;;  %387 = vst.msk [vmem:[%s197_s5] sm:$0xff] %vm257_vm2, %v382_v57 }
  0xfa   : > { %v385_v1 = vmul.f32 %v380_v60, %v345_v59  ;;  %388 = vst.msk [vmem:[%s197_s5 + $0x8] sm:$0xff] %vm257_vm2, %v383_v61 }
  0xfb   : > { %v386_v2 = vmul.f32 %v381_v63, %v346_v62  ;;  %389 = vst.msk [vmem:[%s197_s5 + $0x10] sm:$0xff] %vm257_vm2, %v384_v0 }
  0xfc   : > { %390 = vst.msk [vmem:[%s197_s5 + $0x18] sm:$0xff] %vm257_vm2, %v385_v1 }
  0xfd   : > { %391 = vst.msk [vmem:[%s197_s5 + $0x20] sm:$0x1] %vm265_vm3, %v386_v2 }
  0xfe PF: > { %s14_s15 = sadd.s32 1, %s500_s15  }
  0xff   : > { %p11_p4 = scmp.ge.s32.totalorder %s14_s15, 4  }
 0x101   :  { %13 = sbr.rel (!%p11_p4) target bundleno = 1 (0x1), region = 66 }

</bundles_post_ra>
